<compile_context>
chip_gen: v5e
topology: v5e:2x2
jax: 0.10.0
libtpu: 0.0.40
codegen_flags: <defaults>
</compile_context>

<pallas_src>
import functools

import jax
import jax.numpy as jnp
from jax.experimental import pallas as pl
from jax.experimental.pallas import tpu as pltpu


# ----------------------------------------------------------------------------
# Single fused kernel: conv (im2col dot) + BN batch-stats + BN affine + ReLU.
# ----------------------------------------------------------------------------
def _fused_conv_bn_relu_kernel(p_ref, w_ref, g_ref, b_ref, o_ref, *, eps, count):
    # p_ref : (K_pad, N*H*W) bf16  im2col patches (lane axis = N*H*W, lane-dense)
    # w_ref : (Cout, K_pad)  bf16  reshaped conv weight
    # g_ref : (Cout, 1) f32  BN gamma
    # b_ref : (Cout, 1) f32  BN beta
    # o_ref : (Cout, N*H*W) f32  relu(bn(conv(x))) output
    acc = jnp.dot(w_ref[...], p_ref[...],
                  preferred_element_type=jnp.float32)              # one MXU dot
    inv_count = 1.0 / count
    mean = jnp.sum(acc, axis=1, keepdims=True) * inv_count          # (Cout, 1) XLU reduce
    centered = acc - mean
    var = jnp.sum(centered * centered, axis=1, keepdims=True) * inv_count  # biased, centered
    scale = g_ref[...] * jax.lax.rsqrt(var + eps)                   # EUP rsqrt
    o_ref[...] = jnp.maximum(centered * scale + b_ref[...], 0.0)    # BN affine + ReLU


def conv_bn_relu_forward(x_nchw, weight_oihw, gamma, beta, eps=1e-5):
    """Forward pass matching the PyTorch module in training mode (batch statistics)."""
    N, Cin, H, W = x_nchw.shape
    Cout = weight_oihw.shape[0]
    HW = H * W
    NHW = N * HW
    K = 9 * Cin
    K_pad = ((K + 15) // 16) * 16          # bf16 sublane packing for the MXU operands

    # --- glue: im2col with lane axis = N*H*W (one lane-dense slab for the whole batch) ---
    x_pad = jnp.pad(x_nchw, ((0, 0), (0, 0), (1, 1), (1, 1)))       # (N, Cin, H+2, W+2)
    taps = jnp.stack([x_pad[:, :, kh:kh + H, kw:kw + W]
                      for kh in range(3) for kw in range(3)], axis=0)   # (9, N, Cin, H, W)
    patches = taps.transpose(0, 2, 1, 3, 4).reshape(K, NHW)             # (9*Cin, N*H*W)
    patches = jnp.pad(patches, ((0, K_pad - K), (0, 0))).astype(jnp.bfloat16)
    # weight OIHW -> (Cout, kh, kw, Cin) -> (Cout, 9*Cin); same K ordering as patches.
    w_t = jnp.transpose(weight_oihw, (0, 2, 3, 1)).reshape(Cout, K)
    w_t = jnp.pad(w_t, ((0, 0), (0, K_pad - K))).astype(jnp.bfloat16)

    gamma2 = gamma.reshape(Cout, 1).astype(jnp.float32)
    beta2 = beta.reshape(Cout, 1).astype(jnp.float32)

    kernel = functools.partial(_fused_conv_bn_relu_kernel,
                               eps=float(eps), count=float(NHW))

    out = pl.pallas_call(
        kernel,
        out_shape=jax.ShapeDtypeStruct((Cout, NHW), jnp.float32),
        grid=(1,),                                   # single block: whole batch in VMEM
        in_specs=[
            pl.BlockSpec((K_pad, NHW), lambda i: (0, 0)),
            pl.BlockSpec((Cout, K_pad), lambda i: (0, 0)),
            pl.BlockSpec((Cout, 1), lambda i: (0, 0)),
            pl.BlockSpec((Cout, 1), lambda i: (0, 0)),
        ],
        out_specs=pl.BlockSpec((Cout, NHW), lambda i: (0, 0)),
        compiler_params=pltpu.CompilerParams(dimension_semantics=("arbitrary",)),
    )(patches, w_t, gamma2, beta2)

    # (Cout, N*H*W) -> NCHW: wrapper-side layout plumbing only.
    return out.reshape(Cout, N, H, W).transpose(1, 0, 2, 3)


def reference_forward(x_nchw, weight_oihw, gamma, beta, eps=1e-5):
    """Pure-JAX f32 reference (lax conv + batch-stat BN + relu) for validation."""
    y = jax.lax.conv_general_dilated(
        x_nchw, weight_oihw,
        window_strides=(1, 1), padding=((1, 1), (1, 1)),
        dimension_numbers=("NCHW", "OIHW", "NCHW"))
    mean = jnp.mean(y, axis=(0, 2, 3), keepdims=True)
    var = jnp.var(y, axis=(0, 2, 3), keepdims=True)
    yn = (y - mean) / jnp.sqrt(var + eps)
    yn = yn * gamma.reshape(1, -1, 1, 1) + beta.reshape(1, -1, 1, 1)
    return jnp.maximum(yn, 0.0)


if __name__ == "__main__":
    # Small shapes consistent with the module: batch=2, in_channels=4,
    # out_channels=8, spatial 16x16.
    N, Cin, Cout, H, W = 2, 4, 8, 16, 16

    key = jax.random.PRNGKey(0)
    kx, kw, kg, kb = jax.random.split(key, 4)

    x = jax.random.normal(kx, (N, Cin, H, W), dtype=jnp.float32)
    # Conv2d(in, out, 3) weight shape: (Cout, Cin, 3, 3); no bias.
    weight = jax.random.normal(kw, (Cout, Cin, 3, 3), dtype=jnp.float32) * 0.1
    # BatchNorm2d(out_channels) affine params (deterministic, non-trivial).
    gamma = 1.0 + 0.1 * jax.random.normal(kg, (Cout,), dtype=jnp.float32)
    beta = 0.1 * jax.random.normal(kb, (Cout,), dtype=jnp.float32)

    fwd = jax.jit(conv_bn_relu_forward)
    out = jax.block_until_ready(fwd(x, weight, gamma, beta))

    ref = jax.block_until_ready(reference_forward(x, weight, gamma, beta))
    assert out.shape == (N, Cout, H, W)
    # Tolerance relaxed vs pure-f32 because matmul operands are bf16 (f32 accumulation).
    assert jnp.allclose(out, ref, atol=3e-2, rtol=3e-2), "mismatch vs reference"

    print("KERNEL_OK")
</pallas_src>

<mosaic_0001>
module attributes {stable_mosaic.version = 11 : i64} {
  func.func @_fused_conv_bn_relu_kernel(%arg0: i32, %arg1: memref<48x512xbf16, #tpu.memory_space<vmem>>, %arg2: memref<8x48xbf16, #tpu.memory_space<vmem>>, %arg3: memref<8x1xf32, #tpu.memory_space<vmem>>, %arg4: memref<8x1xf32, #tpu.memory_space<vmem>>, %arg5: memref<8x512xf32, #tpu.memory_space<vmem>>) attributes {dimension_semantics = [#tpu.dimension_semantics<arbitrary>], iteration_bounds = array<i64: 1>, scalar_prefetch = 0 : i64, scratch_operands = 0 : i64, tpu.core_type = #tpu.core_type<tc>, window_params = [{pipeline_mode = #tpu.pipeline_mode<synchronous>, transform_indices = @transform_0, window_bounds = array<i64: 48, 512>}, {pipeline_mode = #tpu.pipeline_mode<synchronous>, transform_indices = @transform_1, window_bounds = array<i64: 8, 48>}, {pipeline_mode = #tpu.pipeline_mode<synchronous>, transform_indices = @transform_2, window_bounds = array<i64: 8, 1>}, {pipeline_mode = #tpu.pipeline_mode<synchronous>, transform_indices = @transform_3, window_bounds = array<i64: 8, 1>}, {pipeline_mode = #tpu.pipeline_mode<synchronous>, transform_indices = @transform_4, window_bounds = array<i64: 8, 512>}]} {
    %c0 = arith.constant 0 : index
    %c0_0 = arith.constant 0 : index
    %0 = vector.load %arg2[%c0, %c0_0] : memref<8x48xbf16, #tpu.memory_space<vmem>>, vector<8x48xbf16>
    %c0_1 = arith.constant 0 : index
    %c0_2 = arith.constant 0 : index
    %1 = vector.load %arg1[%c0_1, %c0_2] : memref<48x512xbf16, #tpu.memory_space<vmem>>, vector<48x512xbf16>
    %cst = arith.constant dense<0.000000e+00> : vector<8x512xf32>
    %2 = tpu.matmul %0, %1, %cst {dimension_numbers = #tpu.dot_dimension_numbers<[1], [0], [0], [1], [0, 0, 1, 1], [], []>} : vector<8x48xbf16>, vector<48x512xbf16>, vector<8x512xf32> -> vector<8x512xf32>
    %cst_3 = arith.constant dense<0.000000e+00> : vector<8xf32>
    %3 = vector.multi_reduction <add>, %2, %cst_3 [1] : vector<8x512xf32> to vector<8xf32>
    %4 = vector.shape_cast %3 : vector<8xf32> to vector<8x1xf32>
    %cst_4 = arith.constant 0.001953125 : f32
    %5 = vector.broadcast %cst_4 : f32 to vector<8x1xf32>
    %6 = arith.mulf %4, %5 : vector<8x1xf32>
    %7 = vector.broadcast %6 : vector<8x1xf32> to vector<8x512xf32>
    %8 = arith.subf %2, %7 : vector<8x512xf32>
    %9 = arith.mulf %8, %8 : vector<8x512xf32>
    %cst_5 = arith.constant dense<0.000000e+00> : vector<8xf32>
    %10 = vector.multi_reduction <add>, %9, %cst_5 [1] : vector<8x512xf32> to vector<8xf32>
    %11 = vector.shape_cast %10 : vector<8xf32> to vector<8x1xf32>
    %cst_6 = arith.constant 0.001953125 : f32
    %12 = vector.broadcast %cst_6 : f32 to vector<8x1xf32>
    %13 = arith.mulf %11, %12 : vector<8x1xf32>
    %c0_7 = arith.constant 0 : index
    %c0_8 = arith.constant 0 : index
    %14 = vector.load %arg3[%c0_7, %c0_8] : memref<8x1xf32, #tpu.memory_space<vmem>>, vector<8x1xf32>
    %cst_9 = arith.constant 9.99999974E-6 : f32
    %15 = vector.broadcast %cst_9 : f32 to vector<8x1xf32>
    %16 = arith.addf %13, %15 : vector<8x1xf32>
    %17 = math.rsqrt %16 : vector<8x1xf32>
    %18 = arith.mulf %14, %17 : vector<8x1xf32>
    %19 = vector.broadcast %18 : vector<8x1xf32> to vector<8x512xf32>
    %20 = arith.mulf %8, %19 : vector<8x512xf32>
    %c0_10 = arith.constant 0 : index
    %c0_11 = arith.constant 0 : index
    %21 = vector.load %arg4[%c0_10, %c0_11] : memref<8x1xf32, #tpu.memory_space<vmem>>, vector<8x1xf32>
    %22 = vector.broadcast %21 : vector<8x1xf32> to vector<8x512xf32>
    %23 = arith.addf %20, %22 : vector<8x512xf32>
    %cst_12 = arith.constant 0.000000e+00 : f32
    %24 = vector.broadcast %cst_12 : f32 to vector<8x512xf32>
    %25 = arith.maximumf %23, %24 : vector<8x512xf32>
    %c0_13 = arith.constant 0 : index
    %c0_14 = arith.constant 0 : index
    %26 = vector.load %arg5[%c0_13, %c0_14] : memref<8x512xf32, #tpu.memory_space<vmem>>, vector<8x512xf32>
    tpu.vector_store %arg5[%c0_13, %c0_14], %25 {strides = array<i32>} : memref<8x512xf32, #tpu.memory_space<vmem>>, vector<8x512xf32>,
    return
  }
  func.func @transform_0(%arg0: i32) -> (i32, i32) {
    %c0_i32 = arith.constant 0 : i32
    %c0_i32_0 = arith.constant 0 : i32
    %c0_i32_1 = arith.constant 0 : i32
    return %c0_i32, %c0_i32_0 : i32, i32
  }
  func.func @transform_1(%arg0: i32) -> (i32, i32) {
    %c0_i32 = arith.constant 0 : i32
    %c0_i32_0 = arith.constant 0 : i32
    %c0_i32_1 = arith.constant 0 : i32
    return %c0_i32, %c0_i32_0 : i32, i32
  }
  func.func @transform_2(%arg0: i32) -> (i32, i32) {
    %c0_i32 = arith.constant 0 : i32
    %c0_i32_0 = arith.constant 0 : i32
    %c0_i32_1 = arith.constant 0 : i32
    return %c0_i32, %c0_i32_0 : i32, i32
  }
  func.func @transform_3(%arg0: i32) -> (i32, i32) {
    %c0_i32 = arith.constant 0 : i32
    %c0_i32_0 = arith.constant 0 : i32
    %c0_i32_1 = arith.constant 0 : i32
    return %c0_i32, %c0_i32_0 : i32, i32
  }
  func.func @transform_4(%arg0: i32) -> (i32, i32) {
    %c0_i32 = arith.constant 0 : i32
    %c0_i32_0 = arith.constant 0 : i32
    %c0_i32_1 = arith.constant 0 : i32
    return %c0_i32, %c0_i32_0 : i32, i32
  }
}

</mosaic_0001>

<bundles_post_ra>
// kernel: conv_bn_relu_forward.1
= control target key start
LH: loop header
LB: loop body
LE: loop exit
PB: predicated region body
PF: predicated region fallthrough
CT: control target
= control target key end

     0   :  { %vm91_vm0 = vcmask 392192   ;;  %v280_v61 = vmov 0   ;;  %s399_s0 = inlined_call_operand.vmem [shape: bf16[48,512], index: 0, kind: input, shape index: {}]   ;;  %s400_s1 = inlined_call_operand.vmem [shape: bf16[8,48], index: 1, kind: input, shape index: {}]   ;;  %s401_s2 = inlined_call_operand.vmem [shape: f32[8,1], index: 2, kind: input, shape index: {}]   ;;  %s402_s3 = inlined_call_operand.vmem [shape: f32[8,1], index: 3, kind: input, shape index: {}]   ;;  %s403_s4 = inlined_call_operand.vmem [shape: f32[8,512], index: 4, kind: output, shape index: {}]  }
   0x1   :  { %v245_v0 = vld [vmem:[%s399_s0 + $0x40] sm:$0xf]  ;;  %v273_v1 = vld [vmem:[%s399_s0 + $0x4c] sm:$0xf0]  ;;  %v271_v2 = vld [vmem:[%s399_s0 + $0x44] sm:$0xf]  ;;  %276 = vset.pattern.permute.xlu1 %v280_v61  ;;  %277 = vset.pattern.permute.xlu0 %v280_v61 }
   0x2   :  { %v246_v3 = vor.u32 %v273_v1, %v245_v0  ;;  %v247_v4 = vld [vmem:[%s399_s0 + $0x50] sm:$0xf0]  ;;  %v253_v5 = vld [vmem:[%s399_s0 + $0x48] sm:$0xf]  ;;  %v274_v6 = vld [vmem:[%s399_s0 + $0x54] sm:$0xf0] }
   0x3   :  { %v250_v7 = vor.u32 %v271_v2, %v247_v4  ;;  %v254_v8 = vor.u32 %v274_v6, %v253_v5  ;;  %v272_v9 = vld [vmem:[%s399_s0 + $0x4c] sm:$0xf]  ;;  %v255_v10 = vld [vmem:[%s399_s0 + $0x58] sm:$0xf0]  ;;  %v229_v11 = vld [vmem:[%s399_s0 + $0x20] sm:$0xf] }
   0x4   :  { %100 = vmatpush.bf16.msra.mxu0 %v246_v3  ;;  %v258_v12 = vor.u32 %v272_v9, %v255_v10  ;;  %v269_v13 = vld [vmem:[%s399_s0 + $0x2c] sm:$0xf0]  ;;  %v267_v14 = vld [vmem:[%s399_s0 + $0x24] sm:$0xf]  ;;  %v231_v15 = vld [vmem:[%s399_s0 + $0x30] sm:$0xf0] }
   0x5   :  { %113 = vmatpush.bf16.msra.mxu1 %v250_v7  ;;  %126 = vmatpush.bf16.msra.mxu2 %v254_v8  ;;  %v230_v16 = vor.u32 %v269_v13, %v229_v11  ;;  %v234_v17 = vor.u32 %v267_v14, %v231_v15  ;;  %v237_v18 = vld [vmem:[%s399_s0 + $0x28] sm:$0xf]  ;;  %v270_v19 = vld [vmem:[%s399_s0 + $0x34] sm:$0xf0]  ;;  %v268_v20 = vld [vmem:[%s399_s0 + $0x2c] sm:$0xf] }
   0x6   :  { %139 = vmatpush.bf16.msra.mxu3 %v258_v12  ;;  %v238_v21 = vor.u32 %v270_v19, %v237_v18  ;;  %v239_v22 = vld [vmem:[%s399_s0 + $0x38] sm:$0xf0]  ;;  %v213_v23 = vld [vmem:[%s399_s0] sm:$0xf]  ;;  %v265_v24 = vld [vmem:[%s399_s0 + $0xc] sm:$0xf0] }
   0x7   :  { %v242_v25 = vor.u32 %v268_v20, %v239_v22  ;;  %v263_v26 = vld [vmem:[%s399_s0 + $0x4] sm:$0xf]  ;;  %v215_v27 = vld [vmem:[%s399_s0 + $0x10] sm:$0xf0]  ;;  %v221_v28 = vld [vmem:[%s399_s0 + $0x8] sm:$0xf]  ;;  %v214_v29 = vor.u32 %v265_v24, %v213_v23 }
   0x8   :  { %101 = vmatpush.bf16.msra.mxu0 %v230_v16  ;;  %v266_v30 = vld [vmem:[%s399_s0 + $0x14] sm:$0xf0]  ;;  %v264_v31 = vld [vmem:[%s399_s0 + $0xc] sm:$0xf]  ;;  %v223_v32 = vld [vmem:[%s399_s0 + $0x18] sm:$0xf0]  ;;  %v218_v33 = vor.u32 %v263_v26, %v215_v27 }
   0x9   :  { %114 = vmatpush.bf16.msra.mxu1 %v234_v17  ;;  %127 = vmatpush.bf16.msra.mxu2 %v238_v21  ;;  %v222_v34 = vor.u32 %v266_v30, %v221_v28  ;;  %v226_v35 = vor.u32 %v264_v31, %v223_v32  ;;  %v18_v36 = vld [vmem:[%s400_s1] sm:$0xf] }
   0xa   :  { %140 = vmatpush.bf16.msra.mxu3 %v242_v25  ;;  %v167_v6 = vld [vmem:[%s401_s2] sm:$0xff] }
   0xb   :  { %v189_v10 = vld [vmem:[%s402_s3] sm:$0xff] }
   0xc   :  { %102 = vmatpush.bf16.msra.mxu0 %v214_v29 }
   0xd   :  { %115 = vmatpush.bf16.msra.mxu1 %v218_v33  ;;  %128 = vmatpush.bf16.msra.mxu2 %v222_v34 }
   0xe   :  { %141 = vmatpush.bf16.msra.mxu3 %v226_v35 }
   0xf   :  { %259 = vmatmul.msk.bf16.vlgmr.msra.gmra.mxu0 %vm91_vm0, %v18_v36 }
  0x10   :  { %260 = vmatmul.msk.bf16.vlgmr.msra.gmra.mxu1 %vm91_vm0, %v18_v36  ;;  %261 = vmatmul.msk.bf16.vlgmr.msra.gmra.mxu2 %vm91_vm0, %v18_v36 }
  0x11   :  { %262 = vmatmul.msk.bf16.vlgmr.msra.gmra.mxu3 %vm91_vm0, %v18_v36 }
  0x8c   :  { %v104_v37 = vpop.f32.mrf.mxu0 }
  0x8d   :  { %v117_v38 = vpop.f32.mrf.mxu1 }
  0x8e   :  { %v147_v39 = vadd.f32 %v117_v38, %v104_v37 }
  0x93   :  { %v130_v40 = vpop.f32.mrf.mxu2 }
  0x94   :  { %v148_v41 = vadd.f32 %v147_v39, %v130_v40  ;;  %v143_v42 = vpop.f32.mrf.mxu3  ;;  %v106_v43 = vpop.f32.mrf.mxu0 }
  0x95   :  { %v119_v44 = vpop.f32.mrf.mxu1 }
  0x96   :  { %v149_v45 = vadd.f32 %v148_v41, %v143_v42 }
  0x98   :  { %150 = vadd.xlane.f32.xlu0 %v149_v45 }
  0x9b   :  { %v132_v46 = vpop.f32.mrf.mxu2 }
  0x9c   :  { %v145_v47 = vpop.f32.mrf.mxu3 }
 0x10b   :  { %v151_v48 = vpop.xlane.xlu0 %150 }
 0x10c   :  { %v152_v49 = vmul.f32 0.001953125, %v151_v48 }
 0x10e   :  { %v153_v50 = vsub.f32 %v104_v37, %v152_v49  ;;  %v154_v51 = vsub.f32 %v117_v38, %v152_v49  ;;  %v155_v52 = vsub.f32 %v130_v40, %v152_v49  ;;  %v156_v53 = vsub.f32 %v143_v42, %v152_v49 }
 0x110   :  { %v157_v54 = vmul.f32 %v153_v50, %v153_v50  ;;  %v158_v55 = vmul.f32 %v154_v51, %v154_v51  ;;  %v159_v56 = vmul.f32 %v155_v52, %v155_v52  ;;  %v160_v58 = vmul.f32 %v156_v53, %v156_v53 }
 0x112   :  { %v161_v57 = vadd.f32 %v158_v55, %v157_v54 }
 0x114   :  { %v162_v59 = vadd.f32 %v161_v57, %v159_v56 }
 0x116   :  { %v163_v60 = vadd.f32 %v162_v59, %v160_v58 }
 0x118   :  { %164 = vadd.xlane.f32.xlu0 %v163_v60 }
 0x18b   :  { %v165_v62 = vpop.xlane.xlu0 %164 }
 0x18c   :  { %v166_v63 = vmul.f32 0.001953125, %v165_v62 }
 0x18e   :  { %v168_v0 = vadd.f32 1e-05, %v166_v63 }
 0x190   :  { %278 = vrsqrt.f32 %v168_v0  ;;  %vm175_vm2 = vweird.f32 %v168_v0 }
 0x196   :  { %v279_v1 = vpop.eup %278 }
 0x197   :  { %v170_v2 = vmul.f32 %v279_v1, %v168_v0  ;;  %vm176_vm1 = vweird.f32 %v279_v1 }
 0x198   :  { %vm177_vm3 = vmor %vm175_vm2, %vm176_vm1 }
 0x199   :  { %v171_v3 = vmul.f32 %v279_v1, %v170_v2 }
 0x19b   :  { %v172_v4 = vmul.f32 0.5, %v171_v3 }
 0x19d   :  { %v173_v5 = vsub.f32 1.5, %v172_v4 }
 0x19f   :  { %v174_v7 = vmul.f32 %v279_v1, %v173_v5 }
 0x1a1   :  { %v178_v8 = vsel %vm177_vm3, %v279_v1, %v174_v7 }
 0x1a2   :  { %v179_v9 = vmul.f32 %v178_v8, %v167_v6 }
 0x1a4   :  { %182 = vperm.xlu1 %276, %v179_v9  }
 0x1ac   :  { %192 = vperm.xlu1 %276, %v189_v10  }
 0x216   :  { %v183_v11 = vpop.permute.xlu1 %182 }
 0x217   :  { %v185_v12 = vmul.f32 %v183_v11, %v153_v50  ;;  %v186_v13 = vmul.f32 %v183_v11, %v154_v51  ;;  %v187_v14 = vmul.f32 %v183_v11, %v155_v52  ;;  %v188_v15 = vmul.f32 %v183_v11, %v156_v53 }
 0x21e   :  { %v193_v16 = vpop.permute.xlu1 %192 }
 0x21f   :  { %v195_v17 = vadd.f32 %v193_v16, %v185_v12  ;;  %v196_v18 = vadd.f32 %v193_v16, %v186_v13  ;;  %v197_v19 = vadd.f32 %v193_v16, %v187_v14  ;;  %v198_v20 = vadd.f32 %v193_v16, %v188_v15 }
 0x221   :  { %v199_v21 = vmax.f32 %v195_v17, 0.0  ;;  %v200_v22 = vmax.f32 %v196_v18, 0.0  ;;  %v201_v23 = vmax.f32 %v197_v19, 0.0  ;;  %v202_v24 = vmax.f32 %v198_v20, 0.0 }
 0x223   :  { %203 = vst [vmem:[%s403_s4] sm:$0xff] %v199_v21 }
 0x224   :  { %204 = vst [vmem:[%s403_s4 + $0x8] sm:$0xff] %v200_v22 }
 0x225   :  { %205 = vst [vmem:[%s403_s4 + $0x10] sm:$0xff] %v201_v23 }
 0x226   :  { %206 = vst [vmem:[%s403_s4 + $0x18] sm:$0xff] %v202_v24 }

</bundles_post_ra>
